<compile_context>
chip_gen: v7x
topology: tpu7x:2x2x1
jax: 0.10.0
libtpu: 0.0.40
codegen_flags: <defaults>
</compile_context>

<pallas_src>
import math
from functools import partial

import jax
import jax.numpy as jnp
from jax.experimental import pallas as pl
from jax.experimental.pallas import tpu as pltpu


def _round_up(x, m):
    return (x + m - 1) // m * m


def _codebook_kernel(x_ref, et_ref, e2_ref, *out_refs, compute_dist):
    # x_ref:  (1, TILE_N, D)   sample tile (native float dtype)
    # et_ref: (1, D, C)        codebook^T in cross-term dtype (VMEM-resident over N)
    # e2_ref: (1, 1, C)        precomputed ||e||^2, f32 (resident over N)
    # outs:   [dist (1,TILE_N,C)]? , ind (1,TILE_N,1) int32
    if compute_dist:
        dist_ref, ind_ref = out_refs
    else:
        (ind_ref,) = out_refs

    x = x_ref[0]                                     # (TN, D)
    et = et_ref[0]                                   # (D, C)
    e2 = e2_ref[0]                                   # (1, C) f32
    TN = x.shape[0]
    C = et.shape[1]

    # Fold -2 into the small TN*D operand (exact power-of-two scale) and feed
    # the MXU directly in the cross-term dtype (bf16 by default).
    xf = x.astype(jnp.float32)
    xs = (xf * (-2.0)).astype(et.dtype)              # (TN, D)
    xe = jax.lax.dot_general(xs, et, (((1,), (0,)), ((), ())),
                             preferred_element_type=jnp.float32)   # (TN, C) = -2 x.e

    # argmin target: ||e||^2 - 2 x.e  (||x||^2 is a per-row constant, so it does
    # not affect the argmin and is only needed for the dist output).
    score = xe + e2                                  # (TN, C) f32

    # First-occurrence tie-break, matching torch.argmax of -cdist / jnp.argmin.
    iota = jax.lax.broadcasted_iota(jnp.int32, (TN, C), 1)
    min_val = jnp.min(score, axis=-1, keepdims=True)
    ind_ref[0] = jnp.min(jnp.where(score == min_val, iota, C),
                         axis=-1, keepdims=True)

    if compute_dist:
        x2 = jnp.sum(xf * xf, axis=-1, keepdims=True)            # (TN, 1)
        d2 = jnp.maximum(score + x2, 0.0)                        # (TN, C)
        if dist_ref.dtype != jnp.float32:
            d2 = d2.astype(dist_ref.dtype)   # bf16 sqrt on v6e/v7x EUP, half the vst bytes
        dist_ref[0] = -jnp.sqrt(d2)
    # TODO(synk): for very large C on v7x, an inner lax.fori_loop over C-chunks
    # (carrying running min/argmin) would bound live TN*C intermediates further.


def euclidean_codebook_forward(x, embed, *,
                               compute_dist=True,
                               tile_n=None,
                               dist_dtype=jnp.float32,
                               cross_term_dtype=jnp.bfloat16,
                               vmem_budget_bytes=None,
                               resident_buffers=None):
    """Forward pass of EuclideanCodebook (inference semantics).

    compute_dist:      most VQ callers discard `dist`; set False to skip the
                       dominant H*N*C writeback and all sqrt work (returns None).
    tile_n:            N-tile size; None -> derived from the VMEM budget.
    dist_dtype:        dtype of returned distances (bf16 halves the writeback).
    cross_term_dtype:  dtype of the x.e matmul (bf16 default = native MXU rate;
                       use jnp.float32 for bit-faithful argmin near ties).
    vmem_budget_bytes: VMEM budget used to size the tile; None -> derived from
                       the chip's capacity (falls back to 48 MiB).
    resident_buffers:  set to 1 on v7x to single-buffer the resident codebook
                       (pipeline_mode=pl.Buffered(1)); None -> Pallas default.
    """
    needs_codebook_dim = x.ndim < 4
    if not jnp.issubdtype(x.dtype, jnp.floating) or x.dtype == jnp.float64:
        x = x.astype(jnp.float32)          # no unconditional HBM-pass upcast of float inputs
    if needs_codebook_dim:
        x = x[None, ...]

    orig_shape = x.shape                   # (h, b, n, d)
    H, D = x.shape[0], x.shape[-1]
    flatten = x.reshape(H, -1, D)          # (h, N, d)
    N = flatten.shape[1]
    C = embed.shape[1]
    assert embed.shape[0] == H and embed.shape[-1] == D

    # Codebook-only work hoisted out of the N loop; both stay VMEM-resident.
    embed_f32 = embed.astype(jnp.float32)
    e2 = jnp.sum(embed_f32 * embed_f32, axis=-1)[:, None, :]          # (H,1,C) f32
    embed_t = jnp.swapaxes(embed, 1, 2).astype(cross_term_dtype)      # (H,D,C) pre-transposed

    x_bytes = jnp.dtype(flatten.dtype).itemsize
    ct_bytes = jnp.dtype(cross_term_dtype).itemsize
    dist_bytes = jnp.dtype(dist_dtype).itemsize if compute_dist else 0

    if vmem_budget_bytes is None:
        try:
            cap = pltpu.get_tpu_info().vmem_capacity_bytes
        except Exception:
            cap = 64 * 1024 * 1024
        vmem_budget_bytes = min(int(cap) * 3 // 4, 112 * 1024 * 1024)

    # Footprint model: resident codebook/e2 (+double buffer unless Buffered(1)),
    # double-buffered x/dist/ind tiles, and a few live TN*C f32 intermediates.
    nbuf = 2 if resident_buffers is None else max(1, int(resident_buffers))
    resident = nbuf * (D * C * ct_bytes + 8 * _round_up(C, 128) * 4)
    per_row = (2 * D * x_bytes                          # x tile (double-buffered)
               + 2 * C * dist_bytes                     # dist tile
               + 2 * 128 * 4                            # ind tile (lane-padded)
               + (4 if compute_dist else 3) * C * 4)    # xe/score/iota/... scratch
    if tile_n is None:
        tile_n = max(8, (vmem_budget_bytes - resident) // max(per_row, 1))
        tile_n = min(int(tile_n), 2048)
        tile_n = (tile_n // 128 * 128) if tile_n >= 128 else (tile_n // 8 * 8)

    if tile_n >= N:
        tile = N                                        # full dim -> no sublane constraint
    else:
        tile = max(8, (tile_n // 8) * 8)                # partial tiles: multiple of 8
    nt = pl.cdiv(N, tile)                               # ragged last tile is masked (no jnp.pad)

    resident_kwargs = {}
    if resident_buffers is not None:
        resident_kwargs = dict(pipeline_mode=pl.Buffered(int(resident_buffers)))

    in_specs = [
        pl.BlockSpec((1, tile, D), lambda h, i: (h, i, 0)),                      # x tile
        pl.BlockSpec((1, D, C), lambda h, i: (h, 0, 0), **resident_kwargs),      # codebook^T
        pl.BlockSpec((1, 1, C), lambda h, i: (h, 0, 0), **resident_kwargs),      # ||e||^2
    ]
    out_specs = []
    out_shape = []
    if compute_dist:
        out_specs.append(pl.BlockSpec((1, tile, C), lambda h, i: (h, i, 0)))
        out_shape.append(jax.ShapeDtypeStruct((H, N, C), dist_dtype))
    out_specs.append(pl.BlockSpec((1, tile, 1), lambda h, i: (h, i, 0)))
    out_shape.append(jax.ShapeDtypeStruct((H, N, 1), jnp.int32))

    cost = pl.CostEstimate(
        flops=2 * H * N * C * D,                                   # single cross-term matmul
        transcendentals=(H * N * C) if compute_dist else 0,
        bytes_accessed=int(H * N * D * x_bytes + H * D * C * ct_bytes + H * C * 4
                           + H * N * C * dist_bytes + H * N * 4),
    )

    kernel = partial(_codebook_kernel, compute_dist=compute_dist)
    outs = pl.pallas_call(
        kernel,
        grid=(H, nt),                       # N innermost -> codebook stays resident
        in_specs=in_specs,
        out_specs=tuple(out_specs),
        out_shape=tuple(out_shape),
        compiler_params=pltpu.CompilerParams(
            dimension_semantics=("parallel", "parallel"),
            vmem_limit_bytes=int(min(max(vmem_budget_bytes, 32 * 1024 * 1024),
                                     128 * 1024 * 1024))),
        cost_estimate=cost,
    )(flatten, embed_t, e2)

    if compute_dist:
        dist, ind = outs
    else:
        dist = None
        ind = outs[0] if isinstance(outs, (tuple, list)) else outs

    ind_flat = ind[..., 0]                                          # (H, N)
    embed_ind = ind_flat.reshape(orig_shape[:-1])                   # (h, b, n)
    # quantize = exact codebook-row gather (wrapper side; replaces the in-kernel
    # one-hot f32 matmul) — bit-exact rows of `embed`, like the PyTorch gather.
    quantize = jnp.take_along_axis(embed, ind_flat[..., None], axis=1)
    quantize = quantize.reshape(orig_shape)

    if needs_codebook_dim:
        quantize = quantize[0]
        embed_ind = embed_ind[0]
    # TODO(synk): training-mode EMA buffer updates (cluster_size / embed_avg),
    # kmeans init, dead-code expiry and gumbel sampling (temp>0) are stateful /
    # distributed host-side logic and are not part of this inference kernel.
    return quantize, embed_ind, dist, embed


def _reference(x, embed):
    # Plain-JAX reference mirroring the PyTorch math (argmax of -cdist ==
    # argmin of ||e||^2 - 2 x.e, since ||x||^2 is constant per row).
    x = x.astype(jnp.float32)
    needs = x.ndim < 4
    if needs:
        x = x[None]
    H, D = x.shape[0], x.shape[-1]
    flat = x.reshape(H, -1, D)
    e = embed.astype(jnp.float32)
    score = (jnp.sum(e ** 2, -1)[:, None, :]
             - 2.0 * jnp.einsum('hnd,hcd->hnc', flat, e))           # (H,N,C)
    d2 = jnp.maximum(score + jnp.sum(flat ** 2, -1, keepdims=True), 0.0)
    dist = -jnp.sqrt(d2)
    ind = jnp.argmin(score, axis=-1)                                 # (H, N)
    quant = jnp.take_along_axis(e, ind[..., None], axis=1).reshape(x.shape)
    ind_r = ind.reshape(x.shape[:-1])
    if needs:
        quant, ind_r = quant[0], ind_r[0]
    return quant, ind_r, dist


def _check_exact(x, embed, **kwargs):
    quantize, embed_ind, dist, embed_out = euclidean_codebook_forward(
        x, embed, cross_term_dtype=jnp.float32, **kwargs)
    jax.block_until_ready((quantize, embed_ind, embed_out))
    q_ref, i_ref, d_ref = _reference(x, embed)

    assert quantize.shape == x.shape
    assert embed_ind.shape == x.shape[:-1]
    assert jnp.array_equal(embed_ind, i_ref.astype(embed_ind.dtype))
    assert jnp.allclose(quantize, q_ref, atol=1e-4, rtol=1e-4)
    if kwargs.get("compute_dist", True):
        assert dist.shape == d_ref.shape
        assert jnp.allclose(dist, d_ref, atol=1e-4, rtol=1e-4)
    else:
        assert dist is None


if __name__ == "__main__":
    key = jax.random.PRNGKey(0)
    kx, ke, kx2 = jax.random.split(key, 3)

    num_codebooks, codebook_size, dim = 1, 128, 32
    b, n = 2, 8

    # deterministic kaiming_uniform-style init for embed (num_codebooks, C, dim)
    fan_in = codebook_size * dim
    bound = math.sqrt(2.0) * math.sqrt(3.0 / fan_in)
    embed = jax.random.uniform(ke, (num_codebooks, codebook_size, dim),
                               minval=-bound, maxval=bound, dtype=jnp.float32)

    x = jax.random.normal(kx, (b, n, dim), dtype=jnp.float32)

    # 1) exact f32 path with dist (auto tile -> single N tile at this size)
    _check_exact(x, embed)

    # 2) ragged N + multi-tile grid (N=18, tile=8 -> masked last tile, no pad)
    x2 = jax.random.normal(kx2, (b, n + 1, dim), dtype=jnp.float32)
    _check_exact(x2, embed, tile_n=8)

    # 3) dist-free fast path (no sqrt, no H*N*C writeback)
    _check_exact(x, embed, compute_dist=False)

    # 4) default bf16 cross term: smoke run + loose dist tolerance
    q, i, d, e_out = euclidean_codebook_forward(x, embed)
    jax.block_until_ready((q, i, d))
    _, _, d_ref = _reference(x, embed)
    assert d.shape == d_ref.shape and jnp.all(jnp.isfinite(d))
    assert jnp.allclose(d, d_ref, atol=7.5e-2, rtol=5e-2)

    # 5) bf16 dist + bf16 cross term (bf16 sqrt / halved writeback path)
    q5, i5, d5, _ = euclidean_codebook_forward(x, embed, dist_dtype=jnp.bfloat16)
    jax.block_until_ready((q5, i5, d5))
    assert d5.dtype == jnp.bfloat16
    assert jnp.allclose(d5.astype(jnp.float32), d_ref, atol=1.5e-1, rtol=5e-2)

    print("KERNEL_OK")
</pallas_src>

<mosaic_0001>
module attributes {stable_mosaic.version = 11 : i64} {
  func.func @_codebook_kernel(%arg0: i32, %arg1: i32, %arg2: memref<1x16x32xf32, #tpu.memory_space<vmem>>, %arg3: memref<1x32x128xf32, #tpu.memory_space<vmem>>, %arg4: memref<1x1x128xf32, #tpu.memory_space<vmem>>, %arg5: memref<1x16x128xf32, #tpu.memory_space<vmem>>, %arg6: memref<1x16x1xi32, #tpu.memory_space<vmem>>) attributes {dimension_semantics = [#tpu.dimension_semantics<parallel>, #tpu.dimension_semantics<parallel>], iteration_bounds = array<i64: 1, 1>, scalar_prefetch = 0 : i64, scratch_operands = 0 : i64, tpu.core_type = #tpu.core_type<tc>, window_params = [{transform_indices = @transform_0, window_bounds = array<i64: 1, 16, 32>}, {transform_indices = @transform_1, window_bounds = array<i64: 1, 32, 128>}, {transform_indices = @transform_2, window_bounds = array<i64: 1, 1, 128>}, {transform_indices = @transform_3, window_bounds = array<i64: 1, 16, 128>}, {transform_indices = @transform_4, window_bounds = array<i64: 1, 16, 1>}]} {
    %c0 = arith.constant 0 : index
    %c0_0 = arith.constant 0 : index
    %c0_1 = arith.constant 0 : index
    %0 = vector.load %arg2[%c0, %c0_0, %c0_1] : memref<1x16x32xf32, #tpu.memory_space<vmem>>, vector<1x16x32xf32>
    %1 = vector.shape_cast %0 : vector<1x16x32xf32> to vector<16x32xf32>
    %c0_2 = arith.constant 0 : index
    %c0_3 = arith.constant 0 : index
    %c0_4 = arith.constant 0 : index
    %2 = vector.load %arg3[%c0_2, %c0_3, %c0_4] : memref<1x32x128xf32, #tpu.memory_space<vmem>>, vector<1x32x128xf32>
    %3 = vector.shape_cast %2 : vector<1x32x128xf32> to vector<32x128xf32>
    %c0_5 = arith.constant 0 : index
    %c0_6 = arith.constant 0 : index
    %c0_7 = arith.constant 0 : index
    %4 = vector.load %arg4[%c0_5, %c0_6, %c0_7] : memref<1x1x128xf32, #tpu.memory_space<vmem>>, vector<1x1x128xf32>
    %5 = vector.shape_cast %4 : vector<1x1x128xf32> to vector<1x128xf32>
    %cst = arith.constant -2.000000e+00 : f32
    %6 = vector.broadcast %cst : f32 to vector<16x32xf32>
    %7 = arith.mulf %1, %6 : vector<16x32xf32>
    %cst_8 = arith.constant dense<0.000000e+00> : vector<16x128xf32>
    %8 = tpu.matmul %7, %3, %cst_8 {dimension_numbers = #tpu.dot_dimension_numbers<[1], [0], [0], [1], [0, 0, 1, 1], [], []>} : vector<16x32xf32>, vector<32x128xf32>, vector<16x128xf32> -> vector<16x128xf32>
    %9 = vector.broadcast %5 : vector<1x128xf32> to vector<16x128xf32>
    %10 = arith.addf %8, %9 : vector<16x128xf32>
    %11 = tpu.iota {dimensions = array<i32: 1>} : vector<16x128xi32>
    %cst_9 = arith.constant dense<0x7F800000> : vector<16xf32>
    %12 = vector.multi_reduction <minimumf>, %10, %cst_9 [1] : vector<16x128xf32> to vector<16xf32>
    %13 = vector.shape_cast %12 : vector<16xf32> to vector<16x1xf32>
    %14 = vector.broadcast %13 : vector<16x1xf32> to vector<16x128xf32>
    %15 = arith.cmpf oeq, %10, %14 : vector<16x128xf32>
    %c128_i32 = arith.constant 128 : i32
    %16 = vector.broadcast %c128_i32 : i32 to vector<16x128xi32>
    %17 = arith.select %15, %11, %16 : vector<16x128xi1>, vector<16x128xi32>
    %cst_10 = arith.constant dense<2147483647> : vector<16xi32>
    %18 = vector.multi_reduction <minsi>, %17, %cst_10 [1] : vector<16x128xi32> to vector<16xi32>
    %19 = vector.shape_cast %18 : vector<16xi32> to vector<16x1xi32>
    %c0_11 = arith.constant 0 : index
    %c0_12 = arith.constant 0 : index
    %c0_13 = arith.constant 0 : index
    %20 = vector.load %arg6[%c0_11, %c0_12, %c0_13] : memref<1x16x1xi32, #tpu.memory_space<vmem>>, vector<1x16x1xi32>
    %21 = vector.shape_cast %20 : vector<1x16x1xi32> to vector<16x1xi32>
    %22 = vector.shape_cast %19 : vector<16x1xi32> to vector<1x16x1xi32>
    tpu.vector_store %arg6[%c0_11, %c0_12, %c0_13], %22 {strides = array<i32>} : memref<1x16x1xi32, #tpu.memory_space<vmem>>, vector<1x16x1xi32>,
    %23 = arith.mulf %1, %1 : vector<16x32xf32>
    %cst_14 = arith.constant dense<0.000000e+00> : vector<16xf32>
    %24 = vector.multi_reduction <add>, %23, %cst_14 [1] : vector<16x32xf32> to vector<16xf32>
    %25 = vector.shape_cast %24 : vector<16xf32> to vector<16x1xf32>
    %26 = vector.broadcast %25 : vector<16x1xf32> to vector<16x128xf32>
    %27 = arith.addf %10, %26 : vector<16x128xf32>
    %cst_15 = arith.constant 0.000000e+00 : f32
    %28 = vector.broadcast %cst_15 : f32 to vector<16x128xf32>
    %29 = arith.maximumf %27, %28 : vector<16x128xf32>
    %30 = math.sqrt %29 : vector<16x128xf32>
    %cst_16 = arith.constant 0.000000e+00 : f32
    %31 = vector.broadcast %cst_16 : f32 to vector<16x128xf32>
    %32 = arith.subf %31, %30 : vector<16x128xf32>
    %c0_17 = arith.constant 0 : index
    %c0_18 = arith.constant 0 : index
    %c0_19 = arith.constant 0 : index
    %33 = vector.load %arg5[%c0_17, %c0_18, %c0_19] : memref<1x16x128xf32, #tpu.memory_space<vmem>>, vector<1x16x128xf32>
    %34 = vector.shape_cast %33 : vector<1x16x128xf32> to vector<16x128xf32>
    %35 = vector.shape_cast %32 : vector<16x128xf32> to vector<1x16x128xf32>
    tpu.vector_store %arg5[%c0_17, %c0_18, %c0_19], %35 {strides = array<i32>} : memref<1x16x128xf32, #tpu.memory_space<vmem>>, vector<1x16x128xf32>,
    return
  }
  func.func @transform_0(%arg0: i32, %arg1: i32) -> (i32, i32, i32) {
    %c0_i32 = arith.constant 0 : i32
    %c0_i32_0 = arith.constant 0 : i32
    return %arg0, %arg1, %c0_i32 : i32, i32, i32
  }
  func.func @transform_1(%arg0: i32, %arg1: i32) -> (i32, i32, i32) {
    %c0_i32 = arith.constant 0 : i32
    %c0_i32_0 = arith.constant 0 : i32
    %c0_i32_1 = arith.constant 0 : i32
    return %arg0, %c0_i32, %c0_i32_0 : i32, i32, i32
  }
  func.func @transform_2(%arg0: i32, %arg1: i32) -> (i32, i32, i32) {
    %c0_i32 = arith.constant 0 : i32
    %c0_i32_0 = arith.constant 0 : i32
    %c0_i32_1 = arith.constant 0 : i32
    return %arg0, %c0_i32, %c0_i32_0 : i32, i32, i32
  }
  func.func @transform_3(%arg0: i32, %arg1: i32) -> (i32, i32, i32) {
    %c0_i32 = arith.constant 0 : i32
    %c0_i32_0 = arith.constant 0 : i32
    return %arg0, %arg1, %c0_i32 : i32, i32, i32
  }
  func.func @transform_4(%arg0: i32, %arg1: i32) -> (i32, i32, i32) {
    %c0_i32 = arith.constant 0 : i32
    %c0_i32_0 = arith.constant 0 : i32
    return %arg0, %arg1, %c0_i32 : i32, i32, i32
  }
}

</mosaic_0001>

<bundles_post_ra>
// kernel: tpu_custom_call.1
= control target key start
LH: loop header
LB: loop body
LE: loop exit
PB: predicated region body
PF: predicated region fallthrough
CT: control target
= control target key end

     0   :  { %10 = vsyncpa [#allocation3], 0  ;;  %s432_s0 = inlined_call_operand.hbm [shape: f32[1,16,32], index: 0, kind: input, shape index: {}]   ;;  %s433_s1 = inlined_call_operand.hbm [shape: f32[1,32,128], index: 1, kind: input, shape index: {}]   ;;  %s434_s2 = inlined_call_operand.vmem [shape: f32[1,1,128], index: 2, kind: input, shape index: {}]   ;;  %s435_s3 = inlined_call_operand.hbm [shape: f32[1,16,128], index: 3, kind: output, shape index: {0}]   ;;  %s436_s4 = inlined_call_operand.vmem [shape: s32[1,16,1], index: 4, kind: output, shape index: {1}]  }
   0x1   :  { %11 = vsyncpa [#allocation6], 0 }
   0x2   :  { %12 = vsyncpa [#allocation4], 0  ;;  %s344_s15 = smov [#allocation2]   ;;  %s272_s19 = scalar_lea.hbm %s432_s0, 256 }
   0x3   :  { %s18_s16 = sshll.u32 %s344_s15, 4  ;;  %p273_p0 = scmp.ne.s32.totalorder %s432_s0, %s272_s19  ;;  %s19_s16 = int_to_ptr.vmem [resolvable:$true] %s18_s16 }
   0x4   :  { %p276_p1 = scmp.lt.u32.totalorder %s272_s19, %s432_s0 }
   0x6   :  { %p278_p2 = pnand %p276_p1, %p273_p0 }
   0x8   :  { %281 = shalt.err (!%p278_p2)
}
   0x9   :  { %s282_s24 = scalar_lea.vmem %s19_s16, 256  ;;  %p287_p4 = scmp.lt.s32.totalorder %s19_s16, %s19_s16 }
   0xa   :  { %p283_p3 = scmp.ne.s32.totalorder %s19_s16, %s282_s24  ;;  %p288_p5 = scmp.lt.s32.totalorder %s282_s24, %s282_s24 }
   0xc   :  { %p289_p6 = por %p288_p5, %p287_p4 }
   0xe   :  { %p290_p7 = pnand %p289_p6, %p283_p3 }
  0x10   :  { %293 = shalt.err (!%p290_p7)
}
  0x11   :  { %s345_s25 = smov 128   ;;  %s346_s26 = smov 8  }
  0x12   :  { %24 = dma.hbm_to_vmem [thread:$0]  %s432_s0, 256, %s19_s16, [#allocation3], %s345_s25, %s345_s25, %s346_s26  }
  0x13   :  { %s347_s29 = smov [#allocation5]   ;;  %s294_s7 = scalar_lea.hbm %s433_s1, 512 }
  0x14   :  { %s30_s30 = sshll.u32 %s347_s29, 4  ;;  %p295_p8 = scmp.ne.s32.totalorder %s433_s1, %s294_s7  ;;  %s31_s30 = int_to_ptr.vmem [resolvable:$true] %s30_s30 }
  0x15   :  { %p298_p9 = scmp.lt.u32.totalorder %s294_s7, %s433_s1 }
  0x17   :  { %p300_p10 = pnand %p298_p9, %p295_p8 }
  0x19   :  { %303 = shalt.err (!%p300_p10)
}
  0x1a   :  { %s304_s12 = scalar_lea.vmem %s31_s30, 512  ;;  %p309_p12 = scmp.lt.s32.totalorder %s31_s30, %s31_s30 }
  0x1b   :  { %p305_p11 = scmp.ne.s32.totalorder %s31_s30, %s304_s12  ;;  %p310_p13 = scmp.lt.s32.totalorder %s304_s12, %s304_s12 }
  0x1d   :  { %p311_p0 = por %p310_p13, %p309_p12 }
  0x1f   :  { %p312_p1 = pnand %p311_p0, %p305_p11 }
  0x21   :  { %315 = shalt.err (!%p312_p1)
}
  0x22   :  { %36 = dma.hbm_to_vmem [thread:$0]  %s433_s1, 512, %s31_s30, [#allocation6], %s345_s25, %s345_s25, %s346_s26  }
  0x23   :  { %338 = dma.done.wait [#allocation3], 256  }
  0x24   :  { %339 = vsyncadd [#allocation3], 4294967040 }
  0x25   :  { %340 = dma.done.wait [#allocation6], 512  }
  0x26   :  { %341 = vsyncadd [#allocation6], 4294966784  ;;  %v47_v0 = vld [vmem:[#allocation5] sm:$0xff]  ;;  %v48_v1 = vld [vmem:[#allocation5 + $0x8] sm:$0xff]  ;;  %vm60_vm0 = vcmask 261120   ;;  %v142_v17 = vlaneseq }
  0x27   :  { %v49_v2 = vld [vmem:[#allocation5 + $0x10] sm:$0xff]  ;;  %v255_v3 = vpack.c.bf16 %v48_v1, %v47_v0  ;;  %v50_v4 = vld [vmem:[#allocation5 + $0x18] sm:$0xff] }
  0x28   :  { %v45_v5 = vld [vmem:[#allocation2] sm:$0xff]  ;;  %v259_v6 = vpack.c.bf16 %v50_v4, %v49_v2  ;;  %v46_v8 = vld [vmem:[#allocation2 + $0x8] sm:$0xff]  ;;  %v143_v18 = vand.u32 127, %v142_v17 }
  0x29   :  { %v52_v7 = vmul.f32 -2.0, %v45_v5  ;;  %256 = vmatprep.subr.bf16.mxu0 %v255_v3  ;;  %v53_v9 = vmul.f32 -2.0, %v46_v8  ;;  %v235_v10 = vld [vmem:[%s434_s2] ss:$0 sm:$0xff]  ;;  %v183_v14 = vmul.f32 %v45_v5, %v45_v5  ;;  %v184_v27 = vmul.f32 %v46_v8, %v46_v8  ;;  %s348_s2 = smov [#allocation7]  }
  0x2a   :  { %258 = vmatpush3.bf16.msra.mxu0 %v255_v3  ;;  %s218_s15 = sshll.u32 %s348_s2, 4  ;;  %s219_s15 = int_to_ptr.vmem [resolvable:$true] %s218_s15 }
  0x2b   :  { %252 = vmatprep.mubr.msk.f32.mxu0 %vm60_vm0, %v52_v7  ;;  %260 = vmatprep.subr.bf16.mxu0 %v259_v6  ;;  %v185_v16 = vsel %vm60_vm0, %v183_v14, 0.0  ;;  %v188_v31 = vsel %vm60_vm0, %v184_v27, 0.0  ;;  %s316_s16 = scalar_lea.vmem %s219_s15, 256  ;;  %p321_p3 = scmp.lt.s32.totalorder %s219_s15, %s219_s15 }
  0x2c   :  { %p317_p2 = scmp.ne.s32.totalorder %s219_s15, %s316_s16  ;;  %p322_p4 = scmp.lt.s32.totalorder %s316_s16, %s316_s16 }
  0x2e   :  { %262 = vmatpush3.bf16.msra.mxu0 %v259_v6  ;;  %p323_p5 = por %p322_p4, %p321_p3 }
  0x30   :  { %p324_p6 = pnand %p323_p5, %p317_p2 }
  0x31   :  { %253 = vmatmul.mubr.msk.f32.vlgmr.msra.gmra.mrb[0].mxu0 %vm60_vm0, %v53_v9 }
 0x104   :  { %v254_v11 = vpop.f32.mrb[0].mxu0 }
 0x105   :  { %v133_v12 = vpop.f32.mrb[1].mxu0  ;;  %v139_v15 = vadd.f32 %v254_v11, %v235_v10 }
 0x106   :  { %v134_v13 = vadd.f32 %v235_v10, %v133_v12 }
 0x108   :  { %144 = vmin.xlane.f32.xlu0 %v134_v13 }
 0x10c   :  { %146 = vmin.xlane.f32.xlu0 %v139_v15 }
 0x110   :  { %186 = vadd.xlane.f32.xlu0 %v185_v16 }
 0x195   :  { %v145_v19 = vpop.xlane.xlu0 %144 }
 0x196   :  { %vm148_vm1 = vcmp.eq.f32.partialorder %v134_v13, %v145_v19 }
 0x197   :  { %v150_v20 = vsel %vm148_vm1, %v143_v18, 128 }
 0x198   :  { %v153_v21 = vshra.s32 %v150_v20, 16  ;;  %v152_v38 = vand.u32 65535, %v150_v20 }
 0x199   :  { %v147_v22 = vpop.xlane.xlu0 %146 }
 0x19a   :  { %vm149_vm2 = vcmp.eq.f32.partialorder %v139_v15, %v147_v22  ;;  %v155_v23 = vcvt.s32.f32 %v153_v21  ;;  %v154_v41 = vcvt.s32.f32 %v152_v38 }
 0x19b   :  { %v151_v24 = vsel %vm149_vm2, %v143_v18, 128 }
 0x19c   :  { %156 = vmin.xlane.f32.xlu1 %v155_v23  ;;  %v167_v25 = vshra.s32 %v151_v24, 16  ;;  %v166_v39 = vand.u32 65535, %v151_v24 }
 0x19d   :  { %v187_v26 = vpop.xlane.xlu0 %186 }
 0x19e   :  { %v191_v28 = vadd.f32 %v187_v26, %v134_v13  ;;  %v169_v29 = vcvt.s32.f32 %v167_v25  ;;  %v168_v44 = vcvt.s32.f32 %v166_v39 }
 0x1a0   :  { %v193_v30 = vmax.f32 %v191_v28, 0.0  ;;  %170 = vmin.xlane.f32.xlu1 %v169_v29 }
 0x1a2   :  { %268 = vrsqrt.f32 %v193_v30  ;;  %vm197_vm3 = vcmp.eq.f32.partialorder %v193_v30, inf  ;;  %v200_v34 = vand.u32 2147483648, %v193_v30  ;;  %vm199_vm4 = vcmp.eq.f32.partialorder %v193_v30, 0.0 }
 0x1a4   :  { %189 = vadd.xlane.f32.xlu1 %v188_v31 }
 0x1ac   :  { %v269_v32 = vpop.eup %268 }
 0x1ad   :  { %v196_v33 = vmul.f32 %v269_v32, %v193_v30 }
 0x1af   :  { %v198_v35 = vsel %vm197_vm3, %v193_v30, %v196_v33 }
 0x1b0   :  { %v201_v36 = vsel %vm199_vm4, %v200_v34, %v198_v35 }
 0x1b1   :  { %v209_v37 = vsub.f32 0.0, %v201_v36 }
 0x1b3   :  { %211 = vst [vmem:[#allocation7] sm:$0xff] %v209_v37 }
 0x229   :  { %v157_v40 = vpop.xlane.xlu1 %156 }
 0x22a   :  { %vm158_vm5 = vcmp.eq.f32.partialorder %v155_v23, %v157_v40 }
 0x22b   :  { %v159_v42 = vsel %vm158_vm5, %v154_v41, inf }
 0x22c   :  { %160 = vmin.xlane.f32.xlu0 %v159_v42 }
 0x22d   :  { %v171_v43 = vpop.xlane.xlu1 %170 }
 0x22e   :  { %vm172_vm6 = vcmp.eq.f32.partialorder %v169_v29, %v171_v43 }
 0x22f   :  { %v173_v45 = vsel %vm172_vm6, %v168_v44, inf }
 0x230   :  { %174 = vmin.xlane.f32.xlu1 %v173_v45 }
 0x231   :  { %v190_v46 = vpop.xlane.xlu1 %189 }
 0x232   :  { %v192_v47 = vadd.f32 %v190_v46, %v139_v15 }
 0x234   :  { %v194_v48 = vmax.f32 %v192_v47, 0.0 }
 0x236   :  { %270 = vrsqrt.f32 %v194_v48  ;;  %vm204_vm7 = vcmp.eq.f32.partialorder %v194_v48, inf  ;;  %v207_v51 = vand.u32 2147483648, %v194_v48  ;;  %vm206_vm8 = vcmp.eq.f32.partialorder %v194_v48, 0.0 }
 0x240   :  { %v271_v49 = vpop.eup %270 }
 0x241   :  { %v203_v50 = vmul.f32 %v271_v49, %v194_v48 }
 0x243   :  { %v205_v52 = vsel %vm204_vm7, %v194_v48, %v203_v50 }
 0x244   :  { %v208_v53 = vsel %vm206_vm8, %v207_v51, %v205_v52 }
 0x245   :  { %v210_v54 = vsub.f32 0.0, %v208_v53 }
 0x247   :  { %212 = vst [vmem:[#allocation7 + $0x8] sm:$0xff] %v210_v54 }
 0x248   :  { %327 = shalt.err (!%p324_p6)
}
 0x249   :  { %s328_s19 = scalar_lea.hbm %s435_s3, 256 }
 0x24a   :  { %p329_p7 = scmp.ne.s32.totalorder %s435_s3, %s328_s19  ;;  %p332_p8 = scmp.lt.u32.totalorder %s328_s19, %s435_s3 }
 0x24c   :  { %p334_p9 = pnand %p332_p8, %p329_p7 }
 0x24e   :  { %337 = shalt.err (!%p334_p9)
}
 0x24f   :  { %224 = dma.vmem_to_hbm [thread:$0]  %s219_s15, 256, %s435_s3, [#allocation4], %s345_s25, %s345_s25, %s346_s26   ;;  %v163_v55 = vcvt.f32.s32 %v157_v40  ;;  %v177_v58 = vcvt.f32.s32 %v171_v43  ;;  %vm180_vm9 = vcmask 7168  }
 0x251   :  { %v164_v57 = vshll.u32 %v163_v55, 16  ;;  %v178_v62 = vshll.u32 %v177_v58, 16 }
 0x2b9   :  { %v161_v56 = vpop.xlane.xlu0 %160 }
 0x2ba   :  { %v162_v59 = vcvt.f32.s32 %v161_v56 }
 0x2bc   :  { %v165_v60 = vadd.s32 %v164_v57, %v162_v59 }
 0x2bd   :  { %v175_v61 = vpop.xlane.xlu1 %174 }
 0x2be   :  { %181 = vst.msk [vmem:[%s436_s4] sm:$0xff] %vm180_vm9, %v165_v60  ;;  %v176_v63 = vcvt.f32.s32 %v175_v61 }
 0x2c0   :  { %v179_v0 = vadd.s32 %v178_v62, %v176_v63 }
 0x2c2   :  { %182 = vst.msk [vmem:[%s436_s4 + $0x8] sm:$0xff] %vm180_vm9, %v179_v0 }
 0x2c3   :  { %342 = dma.done.wait [#allocation4], 256  }
 0x2c4   :  { %343 = vsyncadd [#allocation4], 4294967040 }
 0x2c5   :  { %232 = vsyncpa [#allocation3], 1 }
 0x2c6   :  { %233 = vsyncpa [#allocation6], 1 }
 0x2c7   :  { %234 = vsyncpa [#allocation4], 1 }

</bundles_post_ra>
